<compile_context>
chip_gen: v7x
topology: tpu7x:2x2x1
jax: 0.10.0
libtpu: 0.0.40
codegen_flags: <defaults>
</compile_context>

<pallas_src>
import jax
import jax.numpy as jnp
from jax import lax
from jax.experimental import pallas as pl
from jax.experimental.pallas import tpu as pltpu

LANES = 128                     # vreg lane width
ACC_ROWS = 64                   # accumulator rows: 8 independent f32 vregs (ILP)
ROW_ALIGN = 64                  # covers f32(8)/bf16(16)/int8(32) packing + ACC_ROWS
MAX_TILE_ROWS = 8192            # 8192*128*4B = 4 MiB per f32 input tile (8 MiB/step)
MIN_KERNEL_ELEMS = 64 * 1024    # below this, pallas_call fixed overhead dominates
VMEM_LIMIT_BYTES = 48 * 1024 * 1024  # headroom on v7x's 64 MiB physical VMEM


def _cdiv(a, b):
    return -(-a // b)


def _round_up(a, b):
    return _cdiv(a, b) * b


def _num_tensorcores_per_chip():
    """Best-effort TC-per-chip detection: 2 on megacore parts (v4/v5p/v7x),
    1 on v5e/v6e.  Wrong guesses only cost a few % (correct either way)."""
    try:
        kind = jax.devices()[0].device_kind.lower()
    except Exception:
        return 2
    for tag in ("v5e", "v5 lite", "v5litepod", "v6e", "v6 lite"):
        if tag in kind:
            return 1
    return 2


def _make_sse_kernel(rows_total, tile_rows, k_steps, needs_mask):
    """Build the sum-of-squared-differences kernel.

    grid = (num_slices, k_steps), dims = ("parallel", "arbitrary")
    x_ref, t_ref : VMEM (tile_rows, LANES) tiles (native dtype, cast in-register)
    out_ref      : VMEM (1, ACC_ROWS, LANES) per-core-slice partial sums (f32)
    acc_ref      : VMEM (ACC_ROWS, LANES)    running partials for this slice
    """

    def kernel(x_ref, t_ref, out_ref, acc_ref):
        c = pl.program_id(0)
        k = pl.program_id(1)

        @pl.when(k == 0)
        def _init():
            acc_ref[...] = jnp.zeros_like(acc_ref)

        d = x_ref[...].astype(jnp.float32) - t_ref[...].astype(jnp.float32)
        sq = d * d

        def _accumulate(vals):
            # Fold rows onto 64 sublane-rows: 8 independent vreg accumulation
            # chains (pure VPU adds), no per-step cross-lane (XLU) reduction.
            acc_ref[...] += jnp.sum(vals.reshape(-1, ACC_ROWS, LANES), axis=0)

        if needs_mask:
            # Only the tail / clamped-duplicate blocks pay for the mask; the
            # steady-state blocks take the un-masked branch.
            row_start = (c * k_steps + k) * tile_rows

            @pl.when(row_start + tile_rows > rows_total)
            def _tail():
                rid = lax.broadcasted_iota(
                    jnp.int32, (tile_rows, LANES), 0) + row_start
                _accumulate(jnp.where(rid < rows_total, sq, 0.0))

            @pl.when(row_start + tile_rows <= rows_total)
            def _full():
                _accumulate(sq)
        else:
            _accumulate(sq)

        @pl.when(k == pl.num_programs(1) - 1)
        def _finalize():
            out_ref[0] = acc_ref[...]

    return kernel


def content_loss_forward(x, target, weight, *, force_num_slices=None):
    """Mimics Content_loss.forward.

    Returns (input_passthrough, loss) with
      loss = mean((input*weight - target*weight)^2) = weight^2 * mean((input-target)^2)
    """
    assert x.shape == target.shape, (x.shape, target.shape)
    w = jnp.float32(weight)
    n_elem = x.size

    # Tiny tensors, or element counts that are not lane multiples, run a
    # trivially fused pure-JAX reduction: no full-array pad/copy, no
    # pallas_call fixed overhead.
    if n_elem < MIN_KERNEL_ELEMS or n_elem % LANES != 0:
        d = x.astype(jnp.float32) - target.astype(jnp.float32)
        loss = (w * w) * jnp.mean(d * d)
        return x, loss

    rows_total = n_elem // LANES

    # --- core split (static) ----------------------------------------------
    if force_num_slices is not None:
        num_slices = max(1, int(force_num_slices))
    elif rows_total <= MAX_TILE_ROWS:
        num_slices = 1                       # splitting would only shrink tiles
    else:
        num_slices = _num_tensorcores_per_chip()
    # TODO(synk): if a v7x profile shows one TC idle with "parallel", switch
    # this axis to pltpu.CORE_PARALLEL (or pl.core_map over a TC mesh).

    # --- tiling (static, shape-dependent) -----------------------------------
    rows_per_slice = _cdiv(rows_total, num_slices)
    tile_rows = min(MAX_TILE_ROWS, _round_up(rows_per_slice, ROW_ALIGN))
    if tile_rows > rows_total:               # never request a block taller than the array
        tile_rows = max(ROW_ALIGN, (rows_total // ROW_ALIGN) * ROW_ALIGN)

    blocks_needed = _cdiv(rows_total, tile_rows)
    k_steps = _cdiv(blocks_needed, num_slices)
    has_dup_blocks = num_slices * k_steps > blocks_needed
    needs_mask = (rows_total % tile_rows != 0) or has_dup_blocks

    if has_dup_blocks:
        last_block = blocks_needed - 1

        def in_index(c, k):
            # Clamp fully-out-of-range block slots onto the last real block;
            # their contribution is zeroed by the in-kernel mask.
            return (jnp.minimum(c * k_steps + k, last_block), 0)
    else:
        def in_index(c, k):
            return (c * k_steps + k, 0)

    # Metadata-only reshape to a lane-dense (rows, 128) slab (no HBM copy).
    x2 = x.reshape(rows_total, LANES)
    t2 = target.reshape(rows_total, LANES)

    itemsize = jnp.dtype(x.dtype).itemsize
    kernel = _make_sse_kernel(rows_total, tile_rows, k_steps, needs_mask)

    partials = pl.pallas_call(
        kernel,
        out_shape=jax.ShapeDtypeStruct((num_slices, ACC_ROWS, LANES), jnp.float32),
        grid_spec=pltpu.PrefetchScalarGridSpec(
            num_scalar_prefetch=0,
            grid=(num_slices, k_steps),
            in_specs=[
                pl.BlockSpec((tile_rows, LANES), in_index),
                pl.BlockSpec((tile_rows, LANES), in_index),
            ],
            out_specs=pl.BlockSpec((1, ACC_ROWS, LANES), lambda c, k: (c, 0, 0)),
            scratch_shapes=[pltpu.VMEM((ACC_ROWS, LANES), jnp.float32)],
        ),
        compiler_params=pltpu.CompilerParams(
            dimension_semantics=("parallel", "arbitrary"),
            vmem_limit_bytes=VMEM_LIMIT_BYTES,
        ),
        cost_estimate=pl.CostEstimate(
            flops=3 * n_elem,
            transcendentals=0,
            bytes_accessed=2 * n_elem * itemsize + num_slices * ACC_ROWS * LANES * 4,
        ),
    )(x2, t2)

    # Tiny epilogue in plain JAX: cross-lane reduce of num_slices*64*128
    # partials, weight^2 scale, divide by the TRUE element count.
    sse = jnp.sum(partials)
    loss = (w * w) * sse / jnp.float32(n_elem)

    # forward() returns the input unchanged.
    return x, loss


def _content_loss_ref(x, t, weight):
    w = jnp.float32(weight)
    return jnp.mean((x.astype(jnp.float32) * w - t.astype(jnp.float32) * w) ** 2)


if __name__ == "__main__":
    key = jax.random.PRNGKey(0)
    kx, kt = jax.random.split(key)
    weight = 0.75

    def check(shape, dtype, rtol, force_num_slices=None):
        x = jax.random.normal(kx, shape, dtype=jnp.float32).astype(dtype)
        t = jax.random.normal(kt, shape, dtype=jnp.float32).astype(dtype)
        out, loss = content_loss_forward(
            x, t, weight, force_num_slices=force_num_slices)
        out = jax.block_until_ready(out)
        loss = jax.block_until_ready(loss)
        ref = _content_loss_ref(x, t, weight)
        assert jnp.allclose(loss, ref, rtol=rtol, atol=1e-6), (shape, dtype, loss, ref)
        assert jnp.array_equal(out, x)

    # Small shape from the module spec -> pure-JAX fast path (no pad, no pallas overhead).
    check((2, 4, 16, 16), jnp.float32, 1e-5)
    # Kernel path, tile-aligned, f32.
    check((2, 8, 64, 64), jnp.float32, 1e-5)
    # Kernel path, rows not a multiple of the tile -> in-kernel tail masking.
    check((2, 67, 16, 32), jnp.float32, 1e-5)
    # Kernel path, bf16 input kept in native dtype through the DMA.
    check((2, 8, 64, 64), jnp.bfloat16, 2e-3)
    # Kernel path, forced 2-way core split with an odd block count ->
    # exercises clamped duplicate blocks + multi-step accumulation.
    check((1, 48, 256, 256), jnp.float32, 1e-5, force_num_slices=2)
    # Non-128-multiple element count -> pure-JAX fallback (no pad copy).
    check((1, 3, 11, 7), jnp.float32, 1e-5)

    print("KERNEL_OK")
</pallas_src>

<mosaic_0001>
module attributes {stable_mosaic.version = 11 : i64} {
  func.func @kernel(%arg0: i32, %arg1: i32, %arg2: memref<512x128xf32, #tpu.memory_space<vmem>>, %arg3: memref<512x128xf32, #tpu.memory_space<vmem>>, %arg4: memref<1x64x128xf32, #tpu.memory_space<vmem>>, %arg5: memref<64x128xf32, #tpu.memory_space<vmem>>) attributes {dimension_semantics = [#tpu.dimension_semantics<parallel>, #tpu.dimension_semantics<arbitrary>], iteration_bounds = array<i64: 1, 1>, scalar_prefetch = 0 : i64, scratch_operands = 1 : i64, tpu.core_type = #tpu.core_type<tc>, window_params = [{transform_indices = @transform_0, window_bounds = array<i64: 512, 128>}, {transform_indices = @transform_1, window_bounds = array<i64: 512, 128>}, {transform_indices = @transform_2, window_bounds = array<i64: 1, 64, 128>}]} {
    %c0_i32 = arith.constant 0 : i32
    %0 = arith.cmpi eq, %arg1, %c0_i32 : i32
    %1 = arith.extui %0 : i1 to i32
    %c0_i32_0 = arith.constant 0 : i32
    %2 = arith.cmpi ne, %1, %c0_i32_0 : i32
    scf.if %2 {
      %cst_10 = arith.constant 0.000000e+00 : f32
      %15 = vector.broadcast %cst_10 : f32 to vector<64x128xf32>
      %c0_11 = arith.constant 0 : index
      %c0_12 = arith.constant 0 : index
      %16 = vector.load %arg5[%c0_11, %c0_12] : memref<64x128xf32, #tpu.memory_space<vmem>>, vector<64x128xf32>
      tpu.vector_store %arg5[%c0_11, %c0_12], %15 {strides = array<i32>} : memref<64x128xf32, #tpu.memory_space<vmem>>, vector<64x128xf32>,
    } else {
    }
    %c0 = arith.constant 0 : index
    %c0_1 = arith.constant 0 : index
    %3 = vector.load %arg2[%c0, %c0_1] : memref<512x128xf32, #tpu.memory_space<vmem>>, vector<512x128xf32>
    %c0_2 = arith.constant 0 : index
    %c0_3 = arith.constant 0 : index
    %4 = vector.load %arg3[%c0_2, %c0_3] : memref<512x128xf32, #tpu.memory_space<vmem>>, vector<512x128xf32>
    %5 = arith.subf %3, %4 : vector<512x128xf32>
    %6 = arith.mulf %5, %5 : vector<512x128xf32>
    %c0_4 = arith.constant 0 : index
    %c0_5 = arith.constant 0 : index
    %7 = vector.load %arg5[%c0_4, %c0_5] : memref<64x128xf32, #tpu.memory_space<vmem>>, vector<64x128xf32>
    %8 = vector.shape_cast %6 : vector<512x128xf32> to vector<8x64x128xf32>
    %cst = arith.constant dense<0.000000e+00> : vector<64x128xf32>
    %9 = vector.multi_reduction <add>, %8, %cst [0] : vector<8x64x128xf32> to vector<64x128xf32>
    %10 = arith.addf %7, %9 : vector<64x128xf32>
    %c0_6 = arith.constant 0 : index
    %c0_7 = arith.constant 0 : index
    %11 = vector.load %arg5[%c0_6, %c0_7] : memref<64x128xf32, #tpu.memory_space<vmem>>, vector<64x128xf32>
    tpu.vector_store %arg5[%c0_6, %c0_7], %10 {strides = array<i32>} : memref<64x128xf32, #tpu.memory_space<vmem>>, vector<64x128xf32>,
    %c0_i32_8 = arith.constant 0 : i32
    %12 = arith.cmpi eq, %arg1, %c0_i32_8 : i32
    %13 = arith.extui %12 : i1 to i32
    %c0_i32_9 = arith.constant 0 : i32
    %14 = arith.cmpi ne, %13, %c0_i32_9 : i32
    scf.if %14 {
      %c0_10 = arith.constant 0 : index
      %c0_11 = arith.constant 0 : index
      %15 = vector.load %arg5[%c0_10, %c0_11] : memref<64x128xf32, #tpu.memory_space<vmem>>, vector<64x128xf32>
      %c0_12 = arith.constant 0 : index
      %c0_13 = arith.constant 0 : index
      %c0_14 = arith.constant 0 : index
      %16 = vector.load %arg4[%c0_12, %c0_13, %c0_14] : memref<1x64x128xf32, #tpu.memory_space<vmem>>, vector<1x64x128xf32>
      %17 = vector.shape_cast %16 : vector<1x64x128xf32> to vector<64x128xf32>
      %18 = vector.shape_cast %15 : vector<64x128xf32> to vector<1x64x128xf32>
      tpu.vector_store %arg4[%c0_12, %c0_13, %c0_14], %18 {strides = array<i32>} : memref<1x64x128xf32, #tpu.memory_space<vmem>>, vector<1x64x128xf32>,
    } else {
    }
    return
  }
  func.func @transform_0(%arg0: i32, %arg1: i32) -> (i32, i32) {
    %c1_i32 = arith.constant 1 : i32
    %0 = arith.muli %arg0, %c1_i32 : i32
    %1 = arith.addi %0, %arg1 : i32
    %c0_i32 = arith.constant 0 : i32
    %c0_i32_0 = arith.constant 0 : i32
    return %1, %c0_i32 : i32, i32
  }
  func.func @transform_1(%arg0: i32, %arg1: i32) -> (i32, i32) {
    %c1_i32 = arith.constant 1 : i32
    %0 = arith.muli %arg0, %c1_i32 : i32
    %1 = arith.addi %0, %arg1 : i32
    %c0_i32 = arith.constant 0 : i32
    %c0_i32_0 = arith.constant 0 : i32
    return %1, %c0_i32 : i32, i32
  }
  func.func @transform_2(%arg0: i32, %arg1: i32) -> (i32, i32, i32) {
    %c0_i32 = arith.constant 0 : i32
    %c0_i32_0 = arith.constant 0 : i32
    %c0_i32_1 = arith.constant 0 : i32
    return %arg0, %c0_i32, %c0_i32_0 : i32, i32, i32
  }
}

</mosaic_0001>

<bundles_post_ra>
// kernel: tpu_custom_call.1
= control target key start
LH: loop header
LB: loop body
LE: loop exit
PB: predicated region body
PF: predicated region fallthrough
CT: control target
= control target key end

     0   :  { %7 = vsyncpa [#allocation4], 0  ;;  %s579_s0 = inlined_call_operand.hbm [shape: f32[512,128], index: 0, kind: input, shape index: {}]   ;;  %s580_s1 = inlined_call_operand.hbm [shape: f32[512,128], index: 1, kind: input, shape index: {}]   ;;  %s581_s2 = inlined_call_operand.hbm [shape: f32[1,64,128], index: 2, kind: output, shape index: {}]  }
   0x1   :  { %8 = vsyncpa [#allocation7], 0 }
   0x2   :  { %9 = vsyncpa [#allocation5], 0  ;;  %s514_s9 = smov [#allocation3]   ;;  %s442_s13 = scalar_lea.hbm %s579_s0, 8192 }
   0x3   :  { %s19_s10 = sshll.u32 %s514_s9, 4  ;;  %p443_p0 = scmp.ne.s32.totalorder %s579_s0, %s442_s13  ;;  %s20_s10 = int_to_ptr.vmem [resolvable:$true] %s19_s10 }
   0x4   :  { %p446_p1 = scmp.lt.u32.totalorder %s442_s13, %s579_s0 }
   0x6   :  { %p448_p2 = pnand %p446_p1, %p443_p0 }
   0x8   :  { %451 = shalt.err (!%p448_p2)
}
   0x9   :  { %s452_s18 = scalar_lea.vmem %s20_s10, 8192  ;;  %p457_p4 = scmp.lt.s32.totalorder %s20_s10, %s20_s10 }
   0xa   :  { %p453_p3 = scmp.ne.s32.totalorder %s20_s10, %s452_s18  ;;  %p458_p5 = scmp.lt.s32.totalorder %s452_s18, %s452_s18 }
   0xc   :  { %p459_p6 = por %p458_p5, %p457_p4 }
   0xe   :  { %p460_p7 = pnand %p459_p6, %p453_p3 }
  0x10   :  { %463 = shalt.err (!%p460_p7)
}
  0x11   :  { %s515_s19 = smov 128   ;;  %s516_s20 = smov 8  }
  0x12   :  { %25 = dma.hbm_to_vmem [thread:$0]  %s579_s0, 8192, %s20_s10, [#allocation4], %s515_s19, %s515_s19, %s516_s20  }
  0x13   :  { %s517_s23 = smov [#allocation6]   ;;  %s464_s27 = scalar_lea.hbm %s580_s1, 8192 }
  0x14   :  { %s35_s24 = sshll.u32 %s517_s23, 4  ;;  %p465_p8 = scmp.ne.s32.totalorder %s580_s1, %s464_s27  ;;  %s36_s24 = int_to_ptr.vmem [resolvable:$true] %s35_s24 }
  0x15   :  { %p468_p9 = scmp.lt.u32.totalorder %s464_s27, %s580_s1 }
  0x17   :  { %p470_p10 = pnand %p468_p9, %p465_p8 }
  0x19   :  { %473 = shalt.err (!%p470_p10)
}
  0x1a   :  { %s474_s4 = scalar_lea.vmem %s36_s24, 8192  ;;  %p479_p12 = scmp.lt.s32.totalorder %s36_s24, %s36_s24 }
  0x1b   :  { %p475_p11 = scmp.ne.s32.totalorder %s36_s24, %s474_s4  ;;  %p480_p13 = scmp.lt.s32.totalorder %s474_s4, %s474_s4 }
  0x1d   :  { %p481_p0 = por %p480_p13, %p479_p12 }
  0x1f   :  { %p482_p1 = pnand %p481_p0, %p475_p11 }
  0x21   :  { %485 = shalt.err (!%p482_p1)
}
  0x22   :  { %41 = dma.hbm_to_vmem [thread:$0]  %s580_s1, 8192, %s36_s24, [#allocation7], %s515_s19, %s515_s19, %s516_s20  }
  0x23   :  { %508 = dma.done.wait [#allocation4], 8192  }
  0x24   :  { %509 = vsyncadd [#allocation4], 4294959104 }
  0x25   :  { %510 = dma.done.wait [#allocation7], 8192  }
  0x26   :  { %511 = vsyncadd [#allocation7], 4294959104  ;;  %v64_v0 = vld [vmem:[#allocation3] sm:$0xff]  ;;  %v65_v24 = vld [vmem:[#allocation3 + $0x8] sm:$0xff]  ;;  %s518_s1 = smov [#allocation8]  }
  0x27   :  { %v72_v1 = vld [vmem:[#allocation3 + $0x40] sm:$0xff]  ;;  %v73_v25 = vld [vmem:[#allocation3 + $0x48] sm:$0xff]  ;;  %v66_v54 = vld [vmem:[#allocation3 + $0x10] sm:$0xff]  ;;  %s424_s6 = sshll.u32 %s518_s1, 4  ;;  %s425_s6 = int_to_ptr.vmem [resolvable:$true] %s424_s6 }
  0x28   :  { %v80_v2 = vld [vmem:[#allocation3 + $0x80] sm:$0xff]  ;;  %v81_v26 = vld [vmem:[#allocation3 + $0x88] sm:$0xff]  ;;  %v74_v55 = vld [vmem:[#allocation3 + $0x50] sm:$0xff]  ;;  %s486_s7 = scalar_lea.vmem %s425_s6, 1024  ;;  %p491_p3 = scmp.lt.s32.totalorder %s425_s6, %s425_s6 }
  0x29   :  { %v88_v3 = vld [vmem:[#allocation3 + $0xc0] sm:$0xff]  ;;  %v89_v27 = vld [vmem:[#allocation3 + $0xc8] sm:$0xff]  ;;  %v82_v60 = vld [vmem:[#allocation3 + $0x90] sm:$0xff]  ;;  %p487_p2 = scmp.ne.s32.totalorder %s425_s6, %s486_s7  ;;  %p492_p4 = scmp.lt.s32.totalorder %s486_s7, %s486_s7 }
  0x2a   :  { %v96_v4 = vld [vmem:[#allocation3 + $0x100] sm:$0xff]  ;;  %v97_v28 = vld [vmem:[#allocation3 + $0x108] sm:$0xff]  ;;  %v90_v61 = vld [vmem:[#allocation3 + $0xd0] sm:$0xff] }
  0x2b   :  { %v128_v5 = vld [vmem:[#allocation6] sm:$0xff]  ;;  %v105_v29 = vld [vmem:[#allocation3 + $0x148] sm:$0xff]  ;;  %p493_p5 = por %p492_p4, %p491_p3 }
  0x2c   :  { %v136_v6 = vld [vmem:[#allocation6 + $0x40] sm:$0xff]  ;;  %v192_v9 = vsub.f32 %v64_v0, %v128_v5  ;;  %v129_v33 = vld [vmem:[#allocation6 + $0x8] sm:$0xff] }
  0x2d   :  { %v144_v7 = vld [vmem:[#allocation6 + $0x80] sm:$0xff]  ;;  %v200_v12 = vsub.f32 %v72_v1, %v136_v6  ;;  %v137_v34 = vld [vmem:[#allocation6 + $0x48] sm:$0xff]  ;;  %v193_v40 = vsub.f32 %v65_v24, %v129_v33  ;;  %p494_p6 = pnand %p493_p5, %p487_p2 }
  0x2e   :  { %v152_v8 = vld [vmem:[#allocation6 + $0xc0] sm:$0xff]  ;;  %v208_v13 = vsub.f32 %v80_v2, %v144_v7  ;;  %v256_v18 = vmul.f32 %v192_v9, %v192_v9  ;;  %v145_v35 = vld [vmem:[#allocation6 + $0x88] sm:$0xff]  ;;  %v201_v41 = vsub.f32 %v73_v25, %v137_v34  ;;  %v98_v2 = vld [vmem:[#allocation3 + $0x110] sm:$0xff] }
  0x2f   :  { %v104_v10 = vld [vmem:[#allocation3 + $0x140] sm:$0xff]  ;;  %v216_v14 = vsub.f32 %v88_v3, %v152_v8  ;;  %v264_v22 = vmul.f32 %v200_v12, %v200_v12  ;;  %v153_v37 = vld [vmem:[#allocation6 + $0xc8] sm:$0xff]  ;;  %v209_v42 = vsub.f32 %v81_v26, %v145_v35  ;;  %v257_v52 = vmul.f32 %v193_v40, %v193_v40  ;;  %v130_v3 = vld [vmem:[#allocation6 + $0x10] sm:$0xff] }
  0x30   :  { %v160_v11 = vld [vmem:[#allocation6 + $0x100] sm:$0xff]  ;;  %v272_v23 = vmul.f32 %v208_v13, %v208_v13  ;;  %v161_v38 = vld [vmem:[#allocation6 + $0x108] sm:$0xff]  ;;  %v217_v48 = vsub.f32 %v89_v27, %v153_v37  ;;  %v265_v53 = vmul.f32 %v201_v41, %v201_v41  ;;  %v146_v7 = vld [vmem:[#allocation6 + $0x90] sm:$0xff] }
  0x31   :  { %v112_v15 = vld [vmem:[#allocation3 + $0x180] sm:$0xff]  ;;  %v224_v21 = vsub.f32 %v96_v4, %v160_v11  ;;  %v280_v31 = vmul.f32 %v216_v14, %v216_v14  ;;  %v328_v32 = vadd.f32 %v264_v22, %v256_v18  ;;  %v169_v39 = vld [vmem:[#allocation6 + $0x148] sm:$0xff]  ;;  %v225_v51 = vsub.f32 %v97_v28, %v161_v38  ;;  %v138_v4 = vld [vmem:[#allocation6 + $0x50] sm:$0xff] }
  0x32   :  { %v168_v16 = vld [vmem:[#allocation6 + $0x140] sm:$0xff]  ;;  %v113_v45 = vld [vmem:[#allocation3 + $0x188] sm:$0xff]  ;;  %v233_v58 = vsub.f32 %v105_v29, %v169_v39  ;;  %v273_v59 = vmul.f32 %v209_v42, %v209_v42  ;;  %v281_v0 = vmul.f32 %v217_v48, %v217_v48  ;;  %v335_v1 = vadd.f32 %v265_v53, %v257_v52  ;;  %v154_v8 = vld [vmem:[#allocation6 + $0xd0] sm:$0xff] }
  0x33   :  { %v176_v17 = vld [vmem:[#allocation6 + $0x180] sm:$0xff]  ;;  %v232_v30 = vsub.f32 %v104_v10, %v168_v16  ;;  %v288_v43 = vmul.f32 %v224_v21, %v224_v21  ;;  %v329_v44 = vadd.f32 %v328_v32, %v272_v23  ;;  %v121_v46 = vld [vmem:[#allocation3 + $0x1c8] sm:$0xff]  ;;  %v162_v9 = vld [vmem:[#allocation6 + $0x110] sm:$0xff]  ;;  %v194_v10 = vsub.f32 %v66_v54, %v130_v3 }
  0x34   :  { %v120_v19 = vld [vmem:[#allocation3 + $0x1c0] sm:$0xff]  ;;  %v240_v36 = vsub.f32 %v112_v15, %v176_v17  ;;  %v177_v47 = vld [vmem:[#allocation6 + $0x188] sm:$0xff]  ;;  %v202_v11 = vsub.f32 %v74_v55, %v138_v4  ;;  %v289_v12 = vmul.f32 %v225_v51, %v225_v51  ;;  %v336_v13 = vadd.f32 %v335_v1, %v273_v59  ;;  %v106_v14 = vld [vmem:[#allocation3 + $0x150] sm:$0xff] }
  0x35   :  { %v184_v20 = vld [vmem:[#allocation6 + $0x1c0] sm:$0xff]  ;;  %v185_v50 = vld [vmem:[#allocation6 + $0x1c8] sm:$0xff]  ;;  %v296_v56 = vmul.f32 %v232_v30, %v232_v30  ;;  %v330_v57 = vadd.f32 %v329_v44, %v280_v31  ;;  %v241_v63 = vsub.f32 %v113_v45, %v177_v47  ;;  %v170_v15 = vld [vmem:[#allocation6 + $0x150] sm:$0xff]  ;;  %v210_v16 = vsub.f32 %v82_v60, %v146_v7 }
  0x36   :  { %v248_v49 = vsub.f32 %v120_v19, %v184_v20  ;;  %v304_v62 = vmul.f32 %v240_v36, %v240_v36  ;;  %v249_v6 = vsub.f32 %v121_v46, %v185_v50  ;;  %v218_v17 = vsub.f32 %v90_v61, %v154_v8  ;;  %v114_v21 = vld [vmem:[#allocation3 + $0x190] sm:$0xff]  ;;  %v67_v30 = vld [vmem:[#allocation3 + $0x18] sm:$0xff]  ;;  %v76_v7 = vld [vmem:[#allocation3 + $0x60] sm:$0xff] }
  0x37   :  { %v331_v5 = vadd.f32 %v330_v57, %v288_v43  ;;  %v297_v20 = vmul.f32 %v233_v58, %v233_v58  ;;  %v178_v22 = vld [vmem:[#allocation6 + $0x190] sm:$0xff]  ;;  %v226_v23 = vsub.f32 %v98_v2, %v162_v9  ;;  %v337_v24 = vadd.f32 %v336_v13, %v281_v0  ;;  %v75_v31 = vld [vmem:[#allocation3 + $0x58] sm:$0xff]  ;;  %v68_v2 = vld [vmem:[#allocation3 + $0x20] sm:$0xff] }
  0x38   :  { %v312_v18 = vmul.f32 %v248_v49, %v248_v49  ;;  %v122_v25 = vld [vmem:[#allocation3 + $0x1d0] sm:$0xff]  ;;  %v258_v27 = vmul.f32 %v194_v10, %v194_v10  ;;  %v266_v28 = vmul.f32 %v202_v11, %v202_v11  ;;  %v274_v29 = vmul.f32 %v210_v16, %v210_v16  ;;  %v83_v32 = vld [vmem:[#allocation3 + $0x98] sm:$0xff]  ;;  %v84_v8 = vld [vmem:[#allocation3 + $0xa0] sm:$0xff] }
  0x39   :  { %v332_v19 = vadd.f32 %v331_v5, %v296_v56  ;;  %v186_v26 = vld [vmem:[#allocation6 + $0x1d0] sm:$0xff]  ;;  %v305_v34 = vmul.f32 %v241_v63, %v241_v63  ;;  %v313_v35 = vmul.f32 %v249_v6, %v249_v6  ;;  %v234_v36 = vsub.f32 %v106_v14, %v170_v15  ;;  %v91_v37 = vld [vmem:[#allocation3 + $0xd8] sm:$0xff]  ;;  %v92_v9 = vld [vmem:[#allocation3 + $0xe0] sm:$0xff] }
  0x3a   :  { %v99_v38 = vld [vmem:[#allocation3 + $0x118] sm:$0xff]  ;;  %v338_v40 = vadd.f32 %v337_v24, %v289_v12  ;;  %v242_v41 = vsub.f32 %v114_v21, %v178_v22  ;;  %v282_v42 = vmul.f32 %v218_v17, %v218_v17  ;;  %v342_v43 = vadd.f32 %v266_v28, %v258_v27  ;;  %v132_v14 = vld [vmem:[#allocation6 + $0x20] sm:$0xff] }
  0x3b   :  { %v333_v33 = vadd.f32 %v332_v19, %v304_v62  ;;  %v131_v39 = vld [vmem:[#allocation6 + $0x18] sm:$0xff]  ;;  %v290_v56 = vmul.f32 %v226_v23, %v226_v23  ;;  %v250_v62 = vsub.f32 %v122_v25, %v186_v26  ;;  %v298_v63 = vmul.f32 %v234_v36, %v234_v36  ;;  %v140_v15 = vld [vmem:[#allocation6 + $0x60] sm:$0xff] }
  0x3c   :  { %v107_v44 = vld [vmem:[#allocation3 + $0x158] sm:$0xff]  ;;  %v195_v52 = vsub.f32 %v67_v30, %v131_v39  ;;  %v339_v55 = vadd.f32 %v338_v40, %v297_v20  ;;  %v343_v57 = vadd.f32 %v342_v43, %v274_v29  ;;  %v306_v10 = vmul.f32 %v242_v41, %v242_v41  ;;  %v148_v16 = vld [vmem:[#allocation6 + $0xa0] sm:$0xff]  ;;  %v77_v43 = vld [vmem:[#allocation3 + $0x68] sm:$0xff] }
  0x3d   :  { %v139_v45 = vld [vmem:[#allocation6 + $0x58] sm:$0xff]  ;;  %v334_v48 = vadd.f32 %v333_v33, %v312_v18  ;;  %v100_v21 = vld [vmem:[#allocation3 + $0x120] sm:$0xff]  ;;  %v196_v27 = vsub.f32 %v68_v2, %v132_v14  ;;  %v204_v28 = vsub.f32 %v76_v7, %v140_v15  ;;  %v212_v29 = vsub.f32 %v84_v8, %v148_v16  ;;  %v70_v14 = vld [vmem:[#allocation3 + $0x30] sm:$0xff] }
  0x3e   :  { %v147_v46 = vld [vmem:[#allocation6 + $0x98] sm:$0xff]  ;;  %v203_v53 = vsub.f32 %v75_v31, %v139_v45  ;;  %v259_v1 = vmul.f32 %v195_v52, %v195_v52  ;;  %v340_v3 = vadd.f32 %v339_v55, %v305_v34  ;;  %v344_v4 = vadd.f32 %v343_v57, %v282_v42  ;;  %v156_v22 = vld [vmem:[#allocation6 + $0xe0] sm:$0xff]  ;;  %v69_v42 = vld [vmem:[#allocation3 + $0x28] sm:$0xff] }
  0x3f   :  { %v155_v47 = vld [vmem:[#allocation6 + $0xd8] sm:$0xff]  ;;  %v211_v54 = vsub.f32 %v83_v32, %v147_v46  ;;  %411 = vst [vmem:[#allocation8] sm:$0xff] %v334_v48  ;;  %v164_v23 = vld [vmem:[#allocation6 + $0x120] sm:$0xff]  ;;  %v220_v30 = vsub.f32 %v92_v9, %v156_v22  ;;  %v314_v31 = vmul.f32 %v250_v62, %v250_v62  ;;  %v260_v40 = vmul.f32 %v196_v27, %v196_v27  ;;  %v149_v57 = vld [vmem:[#allocation6 + $0xa8] sm:$0xff] }
  0x40   :  { %v115_v49 = vld [vmem:[#allocation3 + $0x198] sm:$0xff]  ;;  %v219_v61 = vsub.f32 %v91_v37, %v155_v47  ;;  %v267_v5 = vmul.f32 %v203_v53, %v203_v53  ;;  %v341_v17 = vadd.f32 %v340_v3, %v313_v35  ;;  %v345_v18 = vadd.f32 %v344_v4, %v290_v56  ;;  %v108_v24 = vld [vmem:[#allocation3 + $0x160] sm:$0xff]  ;;  %v101_v56 = vld [vmem:[#allocation3 + $0x128] sm:$0xff] }
  0x41   :  { %v123_v50 = vld [vmem:[#allocation3 + $0x1d8] sm:$0xff]  ;;  %v275_v6 = vmul.f32 %v211_v54, %v211_v54  ;;  %v116_v25 = vld [vmem:[#allocation3 + $0x1a0] sm:$0xff]  ;;  %v228_v39 = vsub.f32 %v100_v21, %v164_v23  ;;  %v268_v41 = vmul.f32 %v204_v28, %v204_v28  ;;  %v276_v48 = vmul.f32 %v212_v29, %v212_v29  ;;  %v109_v62 = vld [vmem:[#allocation3 + $0x168] sm:$0xff] }
  0x42   :  { %v163_v51 = vld [vmem:[#allocation6 + $0x118] sm:$0xff]  ;;  %v283_v19 = vmul.f32 %v219_v61, %v219_v61  ;;  %v349_v20 = vadd.f32 %v267_v5, %v259_v1  ;;  %v172_v26 = vld [vmem:[#allocation6 + $0x160] sm:$0xff]  ;;  %412 = vst [vmem:[#allocation8 + $0x8] sm:$0xff] %v341_v17  ;;  %v346_v32 = vadd.f32 %v345_v18, %v298_v63  ;;  %v284_v55 = vmul.f32 %v220_v30, %v220_v30  ;;  %v117_v63 = vld [vmem:[#allocation3 + $0x1a8] sm:$0xff] }
  0x43   :  { %v171_v58 = vld [vmem:[#allocation6 + $0x158] sm:$0xff]  ;;  %v227_v0 = vsub.f32 %v99_v38, %v163_v51  ;;  %v124_v36 = vld [vmem:[#allocation3 + $0x1e0] sm:$0xff]  ;;  %v236_v47 = vsub.f32 %v108_v24, %v172_v26  ;;  %v141_v51 = vld [vmem:[#allocation6 + $0x68] sm:$0xff]  ;;  %v356_v61 = vadd.f32 %v268_v41, %v260_v40 }
  0x44   :  { %v179_v59 = vld [vmem:[#allocation6 + $0x198] sm:$0xff]  ;;  %v235_v11 = vsub.f32 %v107_v44, %v171_v58  ;;  %v350_v34 = vadd.f32 %v349_v20, %v275_v6  ;;  %v180_v35 = vld [vmem:[#allocation6 + $0x1a0] sm:$0xff]  ;;  %v85_v44 = vld [vmem:[#allocation3 + $0xa8] sm:$0xff]  ;;  %v347_v45 = vadd.f32 %v346_v32, %v306_v10  ;;  %v205_v6 = vsub.f32 %v77_v43, %v141_v51 }
  0x45   :  { %v187_v60 = vld [vmem:[#allocation6 + $0x1d8] sm:$0xff]  ;;  %v243_v12 = vsub.f32 %v115_v49, %v179_v59  ;;  %v291_v33 = vmul.f32 %v227_v0, %v227_v0  ;;  %v188_v37 = vld [vmem:[#allocation6 + $0x1e0] sm:$0xff]  ;;  %v93_v49 = vld [vmem:[#allocation3 + $0xe8] sm:$0xff]  ;;  %v244_v54 = vsub.f32 %v116_v25, %v180_v35  ;;  %v213_v7 = vsub.f32 %v85_v44, %v149_v57 }
  0x46   :  { %v251_v13 = vsub.f32 %v123_v50, %v187_v60  ;;  %v299_v38 = vmul.f32 %v235_v11, %v235_v11  ;;  %v351_v46 = vadd.f32 %v350_v34, %v283_v19  ;;  %v133_v50 = vld [vmem:[#allocation6 + $0x28] sm:$0xff]  ;;  %v348_v59 = vadd.f32 %v347_v45, %v314_v31  ;;  %v78_v15 = vld [vmem:[#allocation3 + $0x70] sm:$0xff] }
  0x47   :  { %v307_v52 = vmul.f32 %v243_v12, %v243_v12  ;;  %v157_v58 = vld [vmem:[#allocation6 + $0xe8] sm:$0xff]  ;;  %v197_v1 = vsub.f32 %v69_v42, %v133_v50  ;;  %v252_v2 = vsub.f32 %v124_v36, %v188_v37  ;;  %v292_v10 = vmul.f32 %v228_v39, %v228_v39  ;;  %v86_v20 = vld [vmem:[#allocation3 + $0xb0] sm:$0xff] }
  0x48   :  { %v315_v53 = vmul.f32 %v251_v13, %v251_v13  ;;  %v352_v60 = vadd.f32 %v351_v46, %v291_v33  ;;  %v165_v0 = vld [vmem:[#allocation6 + $0x128] sm:$0xff]  ;;  %v221_v8 = vsub.f32 %v93_v49, %v157_v58  ;;  %413 = vst [vmem:[#allocation8 + $0x10] sm:$0xff] %v348_v59  ;;  %v300_v11 = vmul.f32 %v236_v47, %v236_v47  ;;  %v94_v21 = vld [vmem:[#allocation3 + $0xf0] sm:$0xff]  ;;  %v135_v59 = vld [vmem:[#allocation6 + $0x38] sm:$0xff] }
  0x49   :  { %v125_v3 = vld [vmem:[#allocation3 + $0x1e8] sm:$0xff]  ;;  %v357_v12 = vadd.f32 %v356_v61, %v276_v48  ;;  %v229_v16 = vsub.f32 %v101_v56, %v165_v0  ;;  %v261_v17 = vmul.f32 %v197_v1, %v197_v1  ;;  %v269_v18 = vmul.f32 %v205_v6, %v205_v6  ;;  %v134_v22 = vld [vmem:[#allocation6 + $0x30] sm:$0xff]  ;;  %v151_v61 = vld [vmem:[#allocation6 + $0xb8] sm:$0xff] }
  0x4a   :  { %v173_v4 = vld [vmem:[#allocation6 + $0x168] sm:$0xff]  ;;  %v353_v9 = vadd.f32 %v352_v60, %v299_v38  ;;  %v277_v19 = vmul.f32 %v213_v7, %v213_v7  ;;  %v308_v24 = vmul.f32 %v244_v54, %v244_v54  ;;  %v142_v27 = vld [vmem:[#allocation6 + $0x70] sm:$0xff]  ;;  %v285_v32 = vmul.f32 %v221_v8, %v221_v8  ;;  %v79_v54 = vld [vmem:[#allocation3 + $0x78] sm:$0xff] }
  0x4b   :  { %v181_v5 = vld [vmem:[#allocation6 + $0x1a8] sm:$0xff]  ;;  %v358_v25 = vadd.f32 %v357_v12, %v284_v55  ;;  %v237_v26 = vsub.f32 %v109_v62, %v173_v4  ;;  %v150_v28 = vld [vmem:[#allocation6 + $0xb0] sm:$0xff]  ;;  %v363_v33 = vadd.f32 %v269_v18, %v261_v17  ;;  %v198_v39 = vsub.f32 %v70_v14, %v134_v22  ;;  %v87_v55 = vld [vmem:[#allocation3 + $0xb8] sm:$0xff] }
  0x4c   :  { %v189_v13 = vld [vmem:[#allocation6 + $0x1e8] sm:$0xff]  ;;  %v354_v23 = vadd.f32 %v353_v9, %v307_v52  ;;  %v158_v29 = vld [vmem:[#allocation6 + $0xf0] sm:$0xff]  ;;  %v245_v30 = vsub.f32 %v117_v63, %v181_v5  ;;  %v206_v40 = vsub.f32 %v78_v15, %v142_v27  ;;  %v293_v41 = vmul.f32 %v229_v16, %v229_v16  ;;  %v71_v52 = vld [vmem:[#allocation3 + $0x38] sm:$0xff] }
  0x4d   :  { %v253_v31 = vsub.f32 %v125_v3, %v189_v13  ;;  %v102_v34 = vld [vmem:[#allocation3 + $0x130] sm:$0xff]  ;;  %v359_v37 = vadd.f32 %v358_v25, %v292_v10  ;;  %v364_v42 = vadd.f32 %v363_v33, %v277_v19  ;;  %v214_v46 = vsub.f32 %v86_v20, %v150_v28  ;;  %v143_v60 = vld [vmem:[#allocation6 + $0x78] sm:$0xff] }
  0x4e   :  { %v166_v36 = vld [vmem:[#allocation6 + $0x130] sm:$0xff]  ;;  %v355_v35 = vadd.f32 %v354_v23, %v315_v53  ;;  %v222_v47 = vsub.f32 %v94_v21, %v158_v29  ;;  %v316_v48 = vmul.f32 %v252_v2, %v252_v2  ;;  %v301_v50 = vmul.f32 %v237_v26, %v237_v26  ;;  %v95_v4 = vld [vmem:[#allocation3 + $0xf8] sm:$0xff] }
  0x4f   :  { %v110_v38 = vld [vmem:[#allocation3 + $0x170] sm:$0xff]  ;;  %v360_v49 = vadd.f32 %v359_v37, %v300_v11  ;;  %v230_v51 = vsub.f32 %v102_v34, %v166_v36  ;;  %v365_v53 = vadd.f32 %v364_v42, %v285_v32  ;;  %v262_v56 = vmul.f32 %v198_v39, %v198_v39  ;;  %v159_v2 = vld [vmem:[#allocation6 + $0xf8] sm:$0xff] }
  0x50   :  { %v118_v43 = vld [vmem:[#allocation3 + $0x1b0] sm:$0xff]  ;;  %414 = vst [vmem:[#allocation8 + $0x18] sm:$0xff] %v355_v35  ;;  %v270_v57 = vmul.f32 %v206_v40, %v206_v40  ;;  %v278_v58 = vmul.f32 %v214_v46, %v214_v46  ;;  %v309_v63 = vmul.f32 %v245_v30, %v245_v30  ;;  %v317_v0 = vmul.f32 %v253_v31, %v253_v31  ;;  %v103_v10 = vld [vmem:[#allocation3 + $0x138] sm:$0xff] }
  0x51   :  { %v174_v44 = vld [vmem:[#allocation6 + $0x170] sm:$0xff]  ;;  %v361_v62 = vadd.f32 %v360_v49, %v308_v24  ;;  %v366_v5 = vadd.f32 %v365_v53, %v293_v41  ;;  %v286_v8 = vmul.f32 %v222_v47, %v222_v47  ;;  %v167_v11 = vld [vmem:[#allocation6 + $0x138] sm:$0xff]  ;;  %v199_v13 = vsub.f32 %v71_v52, %v135_v59 }
  0x52   :  { %v182_v45 = vld [vmem:[#allocation6 + $0x1b0] sm:$0xff]  ;;  %v238_v3 = vsub.f32 %v110_v38, %v174_v44  ;;  %v370_v9 = vadd.f32 %v270_v57, %v262_v56  ;;  %v207_v14 = vsub.f32 %v79_v54, %v143_v60  ;;  %v215_v15 = vsub.f32 %v87_v55, %v151_v61  ;;  %v111_v19 = vld [vmem:[#allocation3 + $0x178] sm:$0xff] }
  0x53   :  { %v126_v1 = vld [vmem:[#allocation3 + $0x1f0] sm:$0xff]  ;;  %v246_v7 = vsub.f32 %v118_v43, %v182_v45  ;;  %v362_v12 = vadd.f32 %v361_v62, %v316_v48  ;;  %v367_v16 = vadd.f32 %v366_v5, %v301_v50  ;;  %v294_v17 = vmul.f32 %v230_v51, %v230_v51  ;;  %v175_v20 = vld [vmem:[#allocation6 + $0x178] sm:$0xff] }
  0x54   :  { %v190_v6 = vld [vmem:[#allocation6 + $0x1f0] sm:$0xff]  ;;  %v371_v18 = vadd.f32 %v370_v9, %v278_v58  ;;  %v223_v21 = vsub.f32 %v95_v4, %v159_v2  ;;  %v302_v23 = vmul.f32 %v238_v3, %v238_v3  ;;  %v231_v24 = vsub.f32 %v103_v10, %v167_v11  ;;  %v119_v31 = vld [vmem:[#allocation3 + $0x1b8] sm:$0xff] }
  0x55   :  { %415 = vst [vmem:[#allocation8 + $0x20] sm:$0xff] %v362_v12  ;;  %v254_v22 = vsub.f32 %v126_v1, %v190_v6  ;;  %v263_v25 = vmul.f32 %v199_v13, %v199_v13  ;;  %v368_v26 = vadd.f32 %v367_v16, %v309_v63  ;;  %v271_v28 = vmul.f32 %v207_v14, %v207_v14  ;;  %v183_v32 = vld [vmem:[#allocation6 + $0x1b8] sm:$0xff] }
  0x56   :  { %v372_v27 = vadd.f32 %v371_v18, %v286_v8  ;;  %v279_v29 = vmul.f32 %v215_v15, %v215_v15  ;;  %v310_v30 = vmul.f32 %v246_v7, %v246_v7  ;;  %v239_v33 = vsub.f32 %v111_v19, %v175_v20  ;;  %v127_v39 = vld [vmem:[#allocation3 + $0x1f8] sm:$0xff] }
  0x57   :  { %v369_v34 = vadd.f32 %v368_v26, %v317_v0  ;;  %v287_v35 = vmul.f32 %v223_v21, %v223_v21  ;;  %v377_v37 = vadd.f32 %v271_v28, %v263_v25  ;;  %v318_v38 = vmul.f32 %v254_v22, %v254_v22  ;;  %v191_v40 = vld [vmem:[#allocation6 + $0x1f8] sm:$0xff] }
  0x58   :  { %v373_v36 = vadd.f32 %v372_v27, %v294_v17  ;;  %v247_v42 = vsub.f32 %v119_v31, %v183_v32  ;;  %v295_v43 = vmul.f32 %v231_v24, %v231_v24  ;;  %v255_v46 = vsub.f32 %v127_v39, %v191_v40 }
  0x59   :  { %416 = vst [vmem:[#allocation8 + $0x28] sm:$0xff] %v369_v34  ;;  %v378_v44 = vadd.f32 %v377_v37, %v279_v29  ;;  %v303_v47 = vmul.f32 %v239_v33, %v239_v33 }
  0x5a   :  { %v374_v41 = vadd.f32 %v373_v36, %v302_v23  ;;  %v311_v50 = vmul.f32 %v247_v42, %v247_v42  ;;  %v319_v52 = vmul.f32 %v255_v46, %v255_v46 }
  0x5b   :  { %v379_v48 = vadd.f32 %v378_v44, %v287_v35 }
  0x5c   :  { %v375_v45 = vadd.f32 %v374_v41, %v310_v30 }
  0x5d   :  { %v380_v51 = vadd.f32 %v379_v48, %v295_v43 }
  0x5e   :  { %v376_v49 = vadd.f32 %v375_v45, %v318_v38 }
  0x5f   :  { %v381_v54 = vadd.f32 %v380_v51, %v303_v47 }
  0x60   :  { %417 = vst [vmem:[#allocation8 + $0x30] sm:$0xff] %v376_v49 }
  0x61   :  { %v382_v55 = vadd.f32 %v381_v54, %v311_v50 }
  0x63   :  { %v383_v53 = vadd.f32 %v382_v55, %v319_v52 }
  0x65   :  { %418 = vst [vmem:[#allocation8 + $0x38] sm:$0xff] %v383_v53 }
  0x66   :  { %497 = shalt.err (!%p494_p6)
}
  0x67   :  { %s498_s10 = scalar_lea.hbm %s581_s2, 1024 }
  0x68   :  { %p499_p7 = scmp.ne.s32.totalorder %s581_s2, %s498_s10  ;;  %p502_p8 = scmp.lt.u32.totalorder %s498_s10, %s581_s2 }
  0x6a   :  { %p504_p9 = pnand %p502_p8, %p499_p7 }
  0x6c   :  { %507 = shalt.err (!%p504_p9)
}
  0x6d   :  { %430 = dma.vmem_to_hbm [thread:$0]  %s425_s6, 1024, %s581_s2, [#allocation5], %s515_s19, %s515_s19, %s516_s20  }
  0x6e   :  { %512 = dma.done.wait [#allocation5], 1024  }
  0x6f   :  { %513 = vsyncadd [#allocation5], 4294966272 }
  0x70   :  { %434 = vsyncpa [#allocation4], 1 }
  0x71   :  { %435 = vsyncpa [#allocation7], 1 }
  0x72   :  { %436 = vsyncpa [#allocation5], 1 }

</bundles_post_ra>
